<compile_context>
chip_gen: v5e
topology: v5e:2x2
jax: 0.10.0
libtpu: 0.0.40
codegen_flags: <defaults>
</compile_context>

<pallas_src>
import jax
import jax.numpy as jnp
from jax.experimental import pallas as pl
from jax.experimental.pallas import tpu as pltpu


def _round_up(x, m):
    return ((x + m - 1) // m) * m


# --------------------------------------------------------------------------
# Pallas kernels
# --------------------------------------------------------------------------

def _mlp_fused_kernel(x_ref, wh1_ref, wh2_ref, wt1_ref, wt2_ref,
                      head_ref, tail_ref):
    # TwoLayerLinear (x2): relu(x @ W1) @ W2, no biases (bias=(False, False)).
    # Head and tail projections share the same input tile -> read x once.
    x = x_ref[...]
    hh = jnp.maximum(
        jnp.dot(x, wh1_ref[...], preferred_element_type=jnp.float32), 0.0)
    head_ref[...] = jnp.dot(hh, wh2_ref[...], preferred_element_type=jnp.float32)
    th = jnp.maximum(
        jnp.dot(x, wt1_ref[...], preferred_element_type=jnp.float32), 0.0)
    tail_ref[...] = jnp.dot(th, wt2_ref[...], preferred_element_type=jnp.float32)


def fused_head_tail_mlp(x2d, wh1, wh2, wt1, wt2, *, tm=512):
    """x2d: (NM, E) -> (head_proj (NM, E), tail_proj (NM, E)), row-tiled."""
    nm, e = x2d.shape
    h = wh1.shape[1]
    o = wh2.shape[1]
    tm = min(tm, _round_up(nm, 8))
    nmp = _round_up(nm, tm)
    if nmp != nm:
        x2d = jnp.concatenate(
            [x2d, jnp.zeros((nmp - nm, e), x2d.dtype)], axis=0)
    head, tail = pl.pallas_call(
        _mlp_fused_kernel,
        out_shape=(jax.ShapeDtypeStruct((nmp, o), jnp.float32),
                   jax.ShapeDtypeStruct((nmp, o), jnp.float32)),
        grid=(nmp // tm,),
        in_specs=[
            pl.BlockSpec((tm, e), lambda i: (i, 0)),
            pl.BlockSpec((e, h), lambda i: (0, 0)),
            pl.BlockSpec((h, o), lambda i: (0, 0)),
            pl.BlockSpec((e, h), lambda i: (0, 0)),
            pl.BlockSpec((h, o), lambda i: (0, 0)),
        ],
        out_specs=(pl.BlockSpec((tm, o), lambda i: (i, 0)),
                   pl.BlockSpec((tm, o), lambda i: (i, 0))),
        compiler_params=pltpu.CompilerParams(
            dimension_semantics=("parallel",)),
    )(x2d, wh1, wh2, wt1, wt2)
    return head[:nm], tail[:nm]


def _bili_lse_kernel(head_ref, tail_ref, mask_ref, w_ref, b_ref, out_ref):
    # One grid step handles B (n, r) pairs; all B*HT head/tail rows share the
    # bilinear weights.  Exact nn.Bilinear:
    #   logits[m, r] = sum_ij head[m,i] * W[r,i,j] * tail[m,j] + b[r]
    bsz, ht, f = head_ref.shape
    nrel = b_ref.shape[-1]
    rows = bsz * ht
    head = head_ref[...].reshape(rows, f)          # (B*HT, F)
    tail = tail_ref[...].reshape(rows, f)          # (B*HT, F)

    lane = jax.lax.broadcasted_iota(jnp.int32, (rows, nrel), 1)
    logits = jnp.zeros((rows, nrel), jnp.float32)
    # Per-relation MXU matmul + VPU mult + lane reduce (no nrel-redundant
    # indicator matmul, no tiled (B*HT, nrel*F) temporary).
    for r in range(nrel):
        hw = jnp.dot(head, w_ref[r], preferred_element_type=jnp.float32)  # (rows, F)
        col = jnp.sum(hw * tail, axis=-1, keepdims=True)                  # (rows, 1)
        logits = logits + jnp.where(lane == r, col, 0.0)
    logits = logits + b_ref[...]                                          # (+ bias)

    # mask + logsumexp over the HT axis, independently for each of the B pairs
    logits = logits.reshape(bsz, ht, nrel)
    logits = logits - (1.0 - mask_ref[...]) * 1e10                        # (B, HT, 1) bcast
    mx = jnp.max(logits, axis=1, keepdims=True)                           # (B, 1, nrel)
    lse = mx + jnp.log(jnp.sum(jnp.exp(logits - mx), axis=1, keepdims=True))
    out_ref[...] = lse[:, 0, :]                                           # (B, nrel)


def bilinear_logsumexp(head, tail, mask, w, b, *, target_rows=256):
    """head/tail: (NR, HT, F) f32, mask: (NR, HT), w: (nrel, F, F), b: (nrel,)."""
    nr, ht, f = head.shape
    nrel = w.shape[0]
    # batch several (n, r) pairs per step so the MXU M-dim is >= ~256 rows
    bsz = max(8, (max(target_rows // ht, 1) // 8) * 8)
    bsz = min(bsz, _round_up(nr, 8))
    nrp = _round_up(nr, bsz)
    mask = mask.astype(jnp.float32)
    if nrp != nr:
        pad = nrp - nr
        head = jnp.concatenate([head, jnp.zeros((pad, ht, f), head.dtype)], axis=0)
        tail = jnp.concatenate([tail, jnp.zeros((pad, ht, f), tail.dtype)], axis=0)
        mask = jnp.concatenate([mask, jnp.zeros((pad, ht), mask.dtype)], axis=0)
    mask3 = mask[..., None]                                                # (NRp, HT, 1)
    b2d = b[None, :]                                                       # (1, nrel)
    out = pl.pallas_call(
        _bili_lse_kernel,
        out_shape=jax.ShapeDtypeStruct((nrp, nrel), jnp.float32),
        grid=(nrp // bsz,),
        in_specs=[
            pl.BlockSpec((bsz, ht, f), lambda i: (i, 0, 0)),
            pl.BlockSpec((bsz, ht, f), lambda i: (i, 0, 0)),
            pl.BlockSpec((bsz, ht, 1), lambda i: (i, 0, 0)),
            pl.BlockSpec((nrel, f, f), lambda i: (0, 0, 0)),   # grid-invariant weights
            pl.BlockSpec((1, nrel), lambda i: (0, 0)),
        ],
        out_specs=pl.BlockSpec((bsz, nrel), lambda i: (i, 0)),
        compiler_params=pltpu.CompilerParams(
            dimension_semantics=("parallel",)),
    )(head, tail, mask3, w, b2d)
    return out[:nr]                                                        # (NR, nrel)


# --------------------------------------------------------------------------
# JAX glue (gathers / span pooling / reshapes)
# --------------------------------------------------------------------------

def span_mean_extract(sentence_repr, spans):
    """SpanExtractor with mean pooling. sentence_repr (N,L,E), spans (N,M,2) inclusive."""
    n, l, e = sentence_repr.shape
    starts = spans[..., 0]                                                 # (N, M)
    ends = spans[..., 1]
    pos = jnp.arange(l)
    m = ((pos[None, None, :] >= starts[..., None]) &
         (pos[None, None, :] <= ends[..., None])).astype(jnp.float32)      # (N, M, L)
    summed = jnp.einsum('nml,nle->nme', m, sentence_repr)
    cnt = jnp.maximum(jnp.sum(m, axis=-1, keepdims=True), 1.0)
    return summed / cnt


def batched_index_select(target, indices):
    """target (B, S, E); indices (B, *dims) -> (B, *dims, E)."""
    b, s, e = target.shape
    flat = indices.reshape(b, -1)
    g = jnp.take_along_axis(target, flat[..., None], axis=1)
    return g.reshape(indices.shape + (e,))


def bran_m_forward(params, sentence_repr, entity_span_indices,
                   head_mentions_indices, head_mentions_indices_mask,
                   tail_mentions_indices, tail_mentions_indices_mask,
                   ht_comb_indices, ht_comb_mask, dis_h_2_t, dis_t_2_h,
                   relation_mask=None, relation_label=None, is_train=True,
                   proj_fn=None, bili_fn=bilinear_logsumexp):
    if proj_fn is None:
        proj_fn = lambda x2d, p: fused_head_tail_mlp(
            x2d, p['head_w1'], p['head_w2'], p['tail_w1'], p['tail_w2'])
    n, l, e = sentence_repr.shape
    m = entity_span_indices.shape[1]
    span_emb = span_mean_extract(sentence_repr, entity_span_indices)       # (N, M, E)
    span2d = span_emb.reshape(n * m, e)
    head2d, tail2d = proj_fn(span2d, params)
    head_proj = head2d.reshape(n, m, e)
    tail_proj = tail2d.reshape(n, m, e)

    head_me = batched_index_select(head_proj, head_mentions_indices)       # (N, R, H, E)
    tail_me = batched_index_select(tail_proj, tail_mentions_indices)       # (N, R, T, E)
    # bi_affine_dropout defaults to 0.0 -> dropout layers are None, skipped.
    head_me = head_me * head_mentions_indices_mask[..., None].astype(jnp.float32)
    tail_me = tail_me * tail_mentions_indices_mask[..., None].astype(jnp.float32)

    _, r, h, _ = head_me.shape
    t = tail_me.shape[2]
    ht = ht_comb_mask.shape[2]
    nr = n * r
    head_me = head_me.reshape(nr, h, e)
    tail_me = tail_me.reshape(nr, t, e)
    head_idx = ht_comb_indices[..., 0].reshape(nr, ht)
    tail_idx = ht_comb_indices[..., 1].reshape(nr, ht)
    head_me = batched_index_select(head_me, head_idx)                      # (NR, HT, E)
    tail_me = batched_index_select(tail_me, tail_idx)                      # (NR, HT, E)

    # use_distance=True: concat distance embeddings (padding_idx=10 row is zero)
    # TODO(synk): fuse this gather+concat into the bilinear kernel (SMEM-prefetched
    # indices + VMEM-resident 20xDIS table) to avoid the (NR, HT, F) HBM round-trip.
    dh = params['dis_embed'][dis_h_2_t.reshape(nr, ht)]                    # (NR, HT, DIS)
    dt = params['dis_embed'][dis_t_2_h.reshape(nr, ht)]
    head_cat = jnp.concatenate([head_me, dh], axis=2)                      # (NR, HT, F)
    tail_cat = jnp.concatenate([tail_me, dt], axis=2)

    mask = ht_comb_mask.reshape(nr, ht).astype(jnp.float32)
    logits = bili_fn(head_cat, tail_cat, mask, params['bili_w'], params['bili_b'])
    nrel = params['bili_b'].shape[0]
    return logits.reshape(n, r, nrel), None


# --------------------------------------------------------------------------
# Pure-JAX reference pieces (for correctness check)
# --------------------------------------------------------------------------

def _proj_ref(x2d, p):
    hp = jax.lax.Precision.HIGHEST
    hh = jnp.dot(jnp.maximum(jnp.dot(x2d, p['head_w1'], precision=hp), 0.0),
                 p['head_w2'], precision=hp)
    tt = jnp.dot(jnp.maximum(jnp.dot(x2d, p['tail_w1'], precision=hp), 0.0),
                 p['tail_w2'], precision=hp)
    return hh, tt


def _bili_lse_ref(head, tail, mask, w, b):
    logits = jnp.einsum('bhi,rij,bhj->bhr', head, w, tail,
                        precision=jax.lax.Precision.HIGHEST) + b
    logits = logits - (1.0 - mask[..., None]) * 1e10
    return jax.nn.logsumexp(logits, axis=1)


def init_params(key, e, dis, nrel):
    ks = jax.random.split(key, 7)
    f = e + dis
    dis_embed = 0.2 * jax.random.normal(ks[4], (20, dis), jnp.float32)
    dis_embed = dis_embed.at[10].set(0.0)   # nn.Embedding padding_idx=10
    return dict(
        head_w1=0.2 * jax.random.normal(ks[0], (e, e), jnp.float32),
        head_w2=0.2 * jax.random.normal(ks[1], (e, e), jnp.float32),
        tail_w1=0.2 * jax.random.normal(ks[2], (e, e), jnp.float32),
        tail_w2=0.2 * jax.random.normal(ks[3], (e, e), jnp.float32),
        dis_embed=dis_embed,
        bili_w=0.02 * jax.random.normal(ks[5], (nrel, f, f), jnp.float32),
        bili_b=0.02 * jax.random.normal(ks[6], (nrel,), jnp.float32),
    )


if __name__ == "__main__":
    N, L, E = 2, 16, 32
    M, R, H, T, HT = 6, 4, 3, 3, 8
    DIS, NREL = 16, 8

    key = jax.random.PRNGKey(0)
    ks = jax.random.split(key, 16)

    sentence_repr = jax.random.normal(ks[0], (N, L, E), jnp.float32)
    starts = jax.random.randint(ks[1], (N, M), 0, L - 4)
    lens = jax.random.randint(ks[2], (N, M), 0, 4)
    entity_span_indices = jnp.stack([starts, starts + lens], axis=-1)      # (N, M, 2)
    head_mentions_indices = jax.random.randint(ks[3], (N, R, H), 0, M)
    head_mentions_indices_mask = jax.random.randint(ks[4], (N, R, H), 0, 2)
    tail_mentions_indices = jax.random.randint(ks[5], (N, R, T), 0, M)
    tail_mentions_indices_mask = jax.random.randint(ks[6], (N, R, T), 0, 2)
    ht_comb_indices = jnp.stack(
        [jax.random.randint(ks[7], (N, R, HT), 0, H),
         jax.random.randint(ks[8], (N, R, HT), 0, T)], axis=-1)            # (N, R, HT, 2)
    ht_comb_mask = jax.random.randint(ks[9], (N, R, HT), 0, 2).at[:, :, 0].set(1)
    dis_h_2_t = jax.random.randint(ks[10], (N, R, HT), 0, 20)
    dis_t_2_h = jax.random.randint(ks[11], (N, R, HT), 0, 20)
    relation_mask = jnp.ones((N, R), jnp.int32)
    relation_label = jnp.zeros((N, R), jnp.int32)

    params = init_params(ks[12], E, DIS, NREL)

    logits, _ = bran_m_forward(
        params, sentence_repr, entity_span_indices,
        head_mentions_indices, head_mentions_indices_mask,
        tail_mentions_indices, tail_mentions_indices_mask,
        ht_comb_indices, ht_comb_mask, dis_h_2_t, dis_t_2_h,
        relation_mask, relation_label, is_train=False)
    logits = jax.block_until_ready(logits)
    assert logits.shape == (N, R, NREL)

    ref_logits, _ = bran_m_forward(
        params, sentence_repr, entity_span_indices,
        head_mentions_indices, head_mentions_indices_mask,
        tail_mentions_indices, tail_mentions_indices_mask,
        ht_comb_indices, ht_comb_mask, dis_h_2_t, dis_t_2_h,
        relation_mask, relation_label, is_train=False,
        proj_fn=_proj_ref, bili_fn=_bili_lse_ref)
    ref_logits = jax.block_until_ready(ref_logits)

    if not jnp.allclose(logits, ref_logits, rtol=1e-2, atol=1e-2):
        max_err = float(jnp.max(jnp.abs(logits - ref_logits)))
        raise AssertionError(f"Pallas output mismatch, max abs err = {max_err}")

    print("KERNEL_OK")
</pallas_src>

<mosaic_0001>
module attributes {stable_mosaic.version = 11 : i64} {
  func.func @_mlp_fused_kernel(%arg0: i32, %arg1: memref<16x32xf32, #tpu.memory_space<vmem>>, %arg2: memref<32x32xf32, #tpu.memory_space<vmem>>, %arg3: memref<32x32xf32, #tpu.memory_space<vmem>>, %arg4: memref<32x32xf32, #tpu.memory_space<vmem>>, %arg5: memref<32x32xf32, #tpu.memory_space<vmem>>, %arg6: memref<16x32xf32, #tpu.memory_space<vmem>>, %arg7: memref<16x32xf32, #tpu.memory_space<vmem>>) attributes {dimension_semantics = [#tpu.dimension_semantics<parallel>], iteration_bounds = array<i64: 1>, scalar_prefetch = 0 : i64, scratch_operands = 0 : i64, tpu.core_type = #tpu.core_type<tc>, window_params = [{transform_indices = @transform_0, window_bounds = array<i64: 16, 32>}, {pipeline_mode = #tpu.pipeline_mode<synchronous>, transform_indices = @transform_1, window_bounds = array<i64: 32, 32>}, {pipeline_mode = #tpu.pipeline_mode<synchronous>, transform_indices = @transform_2, window_bounds = array<i64: 32, 32>}, {pipeline_mode = #tpu.pipeline_mode<synchronous>, transform_indices = @transform_3, window_bounds = array<i64: 32, 32>}, {pipeline_mode = #tpu.pipeline_mode<synchronous>, transform_indices = @transform_4, window_bounds = array<i64: 32, 32>}, {transform_indices = @transform_5, window_bounds = array<i64: 16, 32>}, {transform_indices = @transform_6, window_bounds = array<i64: 16, 32>}]} {
    %c0 = arith.constant 0 : index
    %c0_0 = arith.constant 0 : index
    %0 = vector.load %arg1[%c0, %c0_0] : memref<16x32xf32, #tpu.memory_space<vmem>>, vector<16x32xf32>
    %c0_1 = arith.constant 0 : index
    %c0_2 = arith.constant 0 : index
    %1 = vector.load %arg2[%c0_1, %c0_2] : memref<32x32xf32, #tpu.memory_space<vmem>>, vector<32x32xf32>
    %cst = arith.constant dense<0.000000e+00> : vector<16x32xf32>
    %2 = tpu.matmul %0, %1, %cst {dimension_numbers = #tpu.dot_dimension_numbers<[1], [0], [0], [1], [0, 0, 1, 1], [], []>} : vector<16x32xf32>, vector<32x32xf32>, vector<16x32xf32> -> vector<16x32xf32>
    %cst_3 = arith.constant 0.000000e+00 : f32
    %3 = vector.broadcast %cst_3 : f32 to vector<16x32xf32>
    %4 = arith.maximumf %2, %3 : vector<16x32xf32>
    %c0_4 = arith.constant 0 : index
    %c0_5 = arith.constant 0 : index
    %5 = vector.load %arg3[%c0_4, %c0_5] : memref<32x32xf32, #tpu.memory_space<vmem>>, vector<32x32xf32>
    %cst_6 = arith.constant dense<0.000000e+00> : vector<16x32xf32>
    %6 = tpu.matmul %4, %5, %cst_6 {dimension_numbers = #tpu.dot_dimension_numbers<[1], [0], [0], [1], [0, 0, 1, 1], [], []>} : vector<16x32xf32>, vector<32x32xf32>, vector<16x32xf32> -> vector<16x32xf32>
    %c0_7 = arith.constant 0 : index
    %c0_8 = arith.constant 0 : index
    %7 = vector.load %arg6[%c0_7, %c0_8] : memref<16x32xf32, #tpu.memory_space<vmem>>, vector<16x32xf32>
    tpu.vector_store %arg6[%c0_7, %c0_8], %6 {strides = array<i32>} : memref<16x32xf32, #tpu.memory_space<vmem>>, vector<16x32xf32>,
    %c0_9 = arith.constant 0 : index
    %c0_10 = arith.constant 0 : index
    %8 = vector.load %arg4[%c0_9, %c0_10] : memref<32x32xf32, #tpu.memory_space<vmem>>, vector<32x32xf32>
    %cst_11 = arith.constant dense<0.000000e+00> : vector<16x32xf32>
    %9 = tpu.matmul %0, %8, %cst_11 {dimension_numbers = #tpu.dot_dimension_numbers<[1], [0], [0], [1], [0, 0, 1, 1], [], []>} : vector<16x32xf32>, vector<32x32xf32>, vector<16x32xf32> -> vector<16x32xf32>
    %cst_12 = arith.constant 0.000000e+00 : f32
    %10 = vector.broadcast %cst_12 : f32 to vector<16x32xf32>
    %11 = arith.maximumf %9, %10 : vector<16x32xf32>
    %c0_13 = arith.constant 0 : index
    %c0_14 = arith.constant 0 : index
    %12 = vector.load %arg5[%c0_13, %c0_14] : memref<32x32xf32, #tpu.memory_space<vmem>>, vector<32x32xf32>
    %cst_15 = arith.constant dense<0.000000e+00> : vector<16x32xf32>
    %13 = tpu.matmul %11, %12, %cst_15 {dimension_numbers = #tpu.dot_dimension_numbers<[1], [0], [0], [1], [0, 0, 1, 1], [], []>} : vector<16x32xf32>, vector<32x32xf32>, vector<16x32xf32> -> vector<16x32xf32>
    %c0_16 = arith.constant 0 : index
    %c0_17 = arith.constant 0 : index
    %14 = vector.load %arg7[%c0_16, %c0_17] : memref<16x32xf32, #tpu.memory_space<vmem>>, vector<16x32xf32>
    tpu.vector_store %arg7[%c0_16, %c0_17], %13 {strides = array<i32>} : memref<16x32xf32, #tpu.memory_space<vmem>>, vector<16x32xf32>,
    return
  }
  func.func @transform_0(%arg0: i32) -> (i32, i32) {
    %c0_i32 = arith.constant 0 : i32
    %c0_i32_0 = arith.constant 0 : i32
    return %arg0, %c0_i32 : i32, i32
  }
  func.func @transform_1(%arg0: i32) -> (i32, i32) {
    %c0_i32 = arith.constant 0 : i32
    %c0_i32_0 = arith.constant 0 : i32
    %c0_i32_1 = arith.constant 0 : i32
    return %c0_i32, %c0_i32_0 : i32, i32
  }
  func.func @transform_2(%arg0: i32) -> (i32, i32) {
    %c0_i32 = arith.constant 0 : i32
    %c0_i32_0 = arith.constant 0 : i32
    %c0_i32_1 = arith.constant 0 : i32
    return %c0_i32, %c0_i32_0 : i32, i32
  }
  func.func @transform_3(%arg0: i32) -> (i32, i32) {
    %c0_i32 = arith.constant 0 : i32
    %c0_i32_0 = arith.constant 0 : i32
    %c0_i32_1 = arith.constant 0 : i32
    return %c0_i32, %c0_i32_0 : i32, i32
  }
  func.func @transform_4(%arg0: i32) -> (i32, i32) {
    %c0_i32 = arith.constant 0 : i32
    %c0_i32_0 = arith.constant 0 : i32
    %c0_i32_1 = arith.constant 0 : i32
    return %c0_i32, %c0_i32_0 : i32, i32
  }
  func.func @transform_5(%arg0: i32) -> (i32, i32) {
    %c0_i32 = arith.constant 0 : i32
    %c0_i32_0 = arith.constant 0 : i32
    return %arg0, %c0_i32 : i32, i32
  }
  func.func @transform_6(%arg0: i32) -> (i32, i32) {
    %c0_i32 = arith.constant 0 : i32
    %c0_i32_0 = arith.constant 0 : i32
    return %arg0, %c0_i32 : i32, i32
  }
}

</mosaic_0001>

<bundles_post_ra>
// kernel: tpu_custom_call.1
= control target key start
LH: loop header
LB: loop body
LE: loop exit
PB: predicated region body
PF: predicated region fallthrough
CT: control target
= control target key end

     0   :  { %12 = vsyncpa [#allocation3], 0  ;;  %s571_s0 = inlined_call_operand.hbm [shape: f32[16,32], index: 0, kind: input, shape index: {}]   ;;  %s572_s1 = inlined_call_operand.hbm [shape: f32[32,32], index: 1, kind: input, shape index: {}]   ;;  %s573_s2 = inlined_call_operand.hbm [shape: f32[32,32], index: 2, kind: input, shape index: {}]   ;;  %s574_s3 = inlined_call_operand.hbm [shape: f32[32,32], index: 3, kind: input, shape index: {}]   ;;  %s575_s4 = inlined_call_operand.hbm [shape: f32[32,32], index: 4, kind: input, shape index: {}]   ;;  %s576_s5 = inlined_call_operand.hbm [shape: f32[16,32], index: 5, kind: output, shape index: {0}]   ;;  %s577_s6 = inlined_call_operand.hbm [shape: f32[16,32], index: 6, kind: output, shape index: {1}]  }
   0x1   :  { %13 = vsyncpa [#allocation6], 0 }
   0x2   :  { %14 = vsyncpa [#allocation9], 0 }
   0x3   :  { %15 = vsyncpa [#allocation4], 0 }
   0x4   :  { %16 = vsyncpa [#allocation13], 0  ;;  %s34_s23 = sshll.u32 %s572_s1, 4  ;;  %s473_s24 = smov [#allocation5]   ;;  %s35_s23 = int_to_ptr.hbm [resolvable:$true] %s34_s23 }
   0x5   :  { %s36_s25 = sshll.u32 %s473_s24, 4  ;;  %s60_s28 = sshll.u32 %s574_s3, 4  ;;  %s37_s25 = int_to_ptr.vmem [resolvable:$true] %s36_s25  ;;  %s61_s28 = int_to_ptr.hbm [resolvable:$true] %s60_s28 }
   0x6   :  { %s474_s29 = smov 128   ;;  %s475_s30 = smov 8  }
   0x7   :  { %42 = dma.hbm_to_vmem [thread:$0]  %s35_s23, 512, %s37_s25, [#allocation6], %s474_s29, %s474_s29, %s475_s30  }
   0x8   :  { %s476_s7 = smov [#allocation8]   ;;  %s21_s1 = sshll.u32 %s571_s0, 4  ;;  %s22_s1 = int_to_ptr.hbm [resolvable:$true] %s21_s1 }
   0x9   :  { %s62_s8 = sshll.u32 %s476_s7, 4  ;;  %s47_s12 = sshll.u32 %s573_s2, 4  ;;  %s63_s8 = int_to_ptr.vmem [resolvable:$true] %s62_s8  ;;  %s48_s12 = int_to_ptr.hbm [resolvable:$true] %s47_s12 }
   0xa   :  { %68 = dma.hbm_to_vmem [thread:$0]  %s61_s28, 512, %s63_s8, [#allocation9], %s474_s29, %s474_s29, %s475_s30  }
   0xb   :  { %s477_s13 = smov [#allocation2]   ;;  %s478_s15 = smov [#allocation7]  }
   0xc   :  { %s23_s14 = sshll.u32 %s477_s13, 4  ;;  %s49_s0 = sshll.u32 %s478_s15, 4  ;;  %s24_s14 = int_to_ptr.vmem [resolvable:$true] %s23_s14  ;;  %s50_s0 = int_to_ptr.vmem [resolvable:$true] %s49_s0 }
   0xd   :  { %29 = dma.hbm_to_vmem [thread:$0]  %s22_s1, 256, %s24_s14, [#allocation3], %s474_s29, %s474_s29, %s475_s30  }
   0xe   :  { %s73_s18 = sshll.u32 %s575_s4, 4  ;;  %s479_s2 = smov [#allocation10]   ;;  %s74_s18 = int_to_ptr.hbm [resolvable:$true] %s73_s18 }
   0xf   :  { %55 = dma.hbm_to_vmem [thread:$0]  %s48_s12, 512, %s50_s0, [#allocation6], %s474_s29, %s474_s29, %s475_s30  }
  0x10   :  { %s75_s19 = sshll.u32 %s479_s2, 4  ;;  %s76_s19 = int_to_ptr.vmem [resolvable:$true] %s75_s19 }
  0x11   :  { %81 = dma.hbm_to_vmem [thread:$0]  %s74_s18, 512, %s76_s19, [#allocation9], %s474_s29, %s474_s29, %s475_s30  }
  0x12   :  { %463 = dma.done.wait [#allocation3], 256  }
  0x13   :  { %464 = vsyncadd [#allocation3], 4294967040 }
  0x14   :  { %465 = dma.done.wait [#allocation6], 1024  }
  0x15   :  { %466 = vsyncadd [#allocation6], 4294966272 }
  0x16   :  { %467 = dma.done.wait [#allocation9], 1024  }
  0x17   :  { %468 = vsyncadd [#allocation9], 4294966272  ;;  %v178_v0 = vld [vmem:[#allocation8 + $0x18] sm:$0xff]  ;;  %v177_v1 = vld [vmem:[#allocation8 + $0x10] sm:$0xff]  ;;  %vm108_vm0 = vcmask 261120   ;;  %s480_s4 = smov [#allocation11]  }
  0x18   :  { %191 = vmatpush.msra.mxu2 %v178_v0  ;;  %v107_v2 = vld [vmem:[#allocation5 + $0x18] sm:$0xff]  ;;  %v176_v3 = vld [vmem:[#allocation8 + $0x8] sm:$0xff]  ;;  %v106_v4 = vld [vmem:[#allocation5 + $0x10] sm:$0xff]  ;;  %s243_s20 = sshll.u32 %s480_s4, 4  ;;  %s245_s23 = sshll.u32 %s576_s5, 4  ;;  %s244_s20 = int_to_ptr.vmem [resolvable:$true] %s243_s20  ;;  %s246_s23 = int_to_ptr.hbm [resolvable:$true] %s245_s23 }
  0x19   :  { %127 = vmatpush.msra.mxu0 %v107_v2  ;;  %v105_v5 = vld [vmem:[#allocation5 + $0x8] sm:$0xff]  ;;  %v207_v6 = vld [vmem:[#allocation10 + $0x18] sm:$0xff]  ;;  %v206_v7 = vld [vmem:[#allocation10 + $0x10] sm:$0xff]  ;;  %s481_s24 = smov [#allocation12]   ;;  %s258_s28 = sshll.u32 %s577_s6, 4  ;;  %s259_s28 = int_to_ptr.hbm [resolvable:$true] %s258_s28 }
  0x1a   :  { %192 = vmatpush.msra.mxu2 %v177_v1  ;;  %v175_v8 = vld [vmem:[#allocation8] sm:$0xff]  ;;  %226 = vmatpush.msra.mxu3 %v207_v6  ;;  %v102_v9 = vld [vmem:[#allocation2] sm:$0xff]  ;;  %v103_v11 = vld [vmem:[#allocation2 + $0x8] sm:$0xff]  ;;  %s256_s25 = sshll.u32 %s481_s24, 4  ;;  %s257_s25 = int_to_ptr.vmem [resolvable:$true] %s256_s25 }
  0x1b   :  { %128 = vmatpush.msra.mxu0 %v106_v4  ;;  %v104_v10 = vld [vmem:[#allocation5] sm:$0xff]  ;;  %v205_v12 = vld [vmem:[#allocation10 + $0x8] sm:$0xff]  ;;  %v143_v13 = vld [vmem:[#allocation7 + $0x18] sm:$0xff] }
  0x1c   :  { %193 = vmatpush.msra.mxu2 %v176_v3  ;;  %227 = vmatpush.msra.mxu3 %v206_v7  ;;  %v204_v14 = vld [vmem:[#allocation10] sm:$0xff]  ;;  %v142_v15 = vld [vmem:[#allocation7 + $0x10] sm:$0xff]  ;;  %v141_v16 = vld [vmem:[#allocation7 + $0x8] sm:$0xff] }
  0x1d   :  { %129 = vmatpush.msra.mxu0 %v105_v5  ;;  %162 = vmatpush.msra.mxu1 %v143_v13  ;;  %v140_v17 = vld [vmem:[#allocation7] sm:$0xff] }
  0x1e   :  { %194 = vmatpush.msra.mxu2 %v175_v8  ;;  %228 = vmatpush.msra.mxu3 %v205_v12 }
  0x1f   :  { %282 = vmatmul.msk.f32.vlgmr.msra.gmra.mxu2 %vm108_vm0, %v102_v9  ;;  %130 = vmatpush.msra.mxu0 %v104_v10 }
  0x20   :  { %278 = vmatmul.msk.f32.vlgmr.msra.gmra.mxu0 %vm108_vm0, %v102_v9  ;;  %229 = vmatpush.msra.mxu3 %v204_v14 }
  0x21   :  { %163 = vmatpush.msra.mxu1 %v142_v15 }
  0x23   :  { %164 = vmatpush.msra.mxu1 %v141_v16 }
  0x25   :  { %165 = vmatpush.msra.mxu1 %v140_v17 }
  0x27   :  { %283 = vmatmul.msk.f32.gmra.mxu2 %vm108_vm0, %v103_v11 }
  0x28   :  { %279 = vmatmul.msk.f32.gmra.mxu0 %vm108_vm0, %v103_v11 }
  0x9d   :  { %v132_v18 = vpop.f32.mrf.mxu0 }
  0x9e   :  { %v138_v19 = vmax.f32 %v132_v18, 0.0 }
  0xa0   :  { %280 = vmatmul.msk.f32.vlgmr.msra.gmra.mxu1 %vm108_vm0, %v138_v19 }
  0xa2   :  { %v196_v20 = vpop.f32.mrf.mxu2 }
  0xa3   :  { %v202_v21 = vmax.f32 %v196_v20, 0.0 }
  0xa5   :  { %284 = vmatmul.msk.f32.vlgmr.msra.gmra.mxu3 %vm108_vm0, %v202_v21  ;;  %v135_v22 = vpop.f32.mrf.mxu0 }
  0xa6   :  { %v139_v23 = vmax.f32 %v135_v22, 0.0 }
  0xa8   :  { %281 = vmatmul.msk.f32.gmra.mxu1 %vm108_vm0, %v139_v23 }
  0xaa   :  { %v199_v24 = vpop.f32.mrf.mxu2 }
  0xab   :  { %v203_v25 = vmax.f32 %v199_v24, 0.0 }
  0xad   :  { %285 = vmatmul.msk.f32.gmra.mxu3 %vm108_vm0, %v203_v25 }
 0x11d   :  { %v167_v26 = vpop.f32.mrf.mxu1 }
 0x11e   :  { %173 = vst.msk [vmem:[#allocation11] sm:$0xff] %vm108_vm0, %v167_v26 }
 0x125   :  { %v170_v27 = vpop.f32.mrf.mxu1 }
 0x126   :  { %174 = vst.msk [vmem:[#allocation11 + $0x8] sm:$0xff] %vm108_vm0, %v170_v27 }
 0x127   :  { %251 = dma.vmem_to_hbm [thread:$0]  %s244_s20, 256, %s246_s23, [#allocation4], %s474_s29, %s474_s29, %s475_s30  }
 0x128   :  { %v231_v28 = vpop.f32.mrf.mxu3 }
 0x129   :  { %237 = vst.msk [vmem:[#allocation12] sm:$0xff] %vm108_vm0, %v231_v28 }
 0x130   :  { %v234_v29 = vpop.f32.mrf.mxu3 }
 0x131   :  { %238 = vst.msk [vmem:[#allocation12 + $0x8] sm:$0xff] %vm108_vm0, %v234_v29 }
 0x132   :  { %264 = dma.vmem_to_hbm [thread:$0]  %s257_s25, 256, %s259_s28, [#allocation13], %s474_s29, %s474_s29, %s475_s30  }
 0x133   :  { %469 = dma.done.wait [#allocation4], 256  }
 0x134   :  { %470 = vsyncadd [#allocation4], 4294967040 }
 0x135   :  { %471 = dma.done.wait [#allocation13], 256  }
 0x136   :  { %472 = vsyncadd [#allocation13], 4294967040 }
 0x137   :  { %273 = vsyncpa [#allocation3], 1 }
 0x138   :  { %274 = vsyncpa [#allocation6], 1 }
 0x139   :  { %275 = vsyncpa [#allocation9], 1 }
 0x13a   :  { %276 = vsyncpa [#allocation4], 1 }
 0x13b   :  { %277 = vsyncpa [#allocation13], 1 }

</bundles_post_ra>
